<compile_context>
chip_gen: v6e
topology: v6e:2x2x1
jax: 0.10.0
libtpu: 0.0.40
codegen_flags: <defaults>
</compile_context>

<pallas_src>
import math
from functools import partial

import jax
import jax.numpy as jnp
from jax import lax
from jax.experimental import pallas as pl
from jax.experimental.pallas import tpu as pltpu

LN_EPS = 1e-12                      # DistilBERT LayerNorm eps
VMEM_LIMIT = 48 * 1024 * 1024       # explicit scoped-VMEM bound (v7x-safe)


# ------------------------------ in-kernel helpers ----------------------------

def _ln(h, g, b):
    mean = jnp.mean(h, axis=-1, keepdims=True)
    var = jnp.mean((h - mean) ** 2, axis=-1, keepdims=True)
    return (h - mean) * lax.rsqrt(var + LN_EPS) * g + b


def _gelu(y):
    # TODO(synk): DistilBERT uses exact erf-GELU; tanh approximation used here
    # (erf has no reliably-lowered Mosaic path).  tanh goes to the EUP slot.
    c = math.sqrt(2.0 / math.pi)
    return 0.5 * y * (1.0 + jnp.tanh(c * (y + 0.044715 * y * y * y)))


def _token_tile(m, target=256):
    """Largest token-tile <= target that divides M and satisfies the sublane rule."""
    if m <= target:
        return m
    for tm in range(target, 7, -8):
        if m % tm == 0:
            return tm
    return m


# ----------------------------- Pallas kernels -------------------------------

def _layernorm_kernel(x_ref, g_ref, b_ref, o_ref):
    o_ref[...] = _ln(x_ref[...], g_ref[...], b_ref[...]).astype(o_ref.dtype)


def layernorm(x, gamma, beta):
    """Plain LayerNorm (no residual) tiled over tokens (embedding LN)."""
    M, H = x.shape
    tm = _token_tile(M)
    return pl.pallas_call(
        _layernorm_kernel,
        out_shape=jax.ShapeDtypeStruct((M, H), jnp.float32),
        grid=(M // tm,),
        in_specs=[pl.BlockSpec((tm, H), lambda i: (i, 0)),
                  pl.BlockSpec((1, H), lambda i: (0, 0)),
                  pl.BlockSpec((1, H), lambda i: (0, 0))],
        out_specs=pl.BlockSpec((tm, H), lambda i: (i, 0)),
        compiler_params=pltpu.CompilerParams(
            dimension_semantics=("parallel",),
            vmem_limit_bytes=VMEM_LIMIT),
    )(x, gamma.reshape(1, H), beta.reshape(1, H))


def _attn_kernel(x_ref, mb_ref, wqkv_ref, bqkv_ref, wo_ref, bo_ref, g_ref, b_ref,
                 o_ref, *, n_heads, head_dim, scale):
    """Per-batch: QKV proj + multi-head attention + output proj + residual + LN."""
    H = n_heads * head_dim
    x = x_ref[0]                                            # (S, H) f32 (residual)

    # Fused QKV projection on the MXU (bf16 operands, f32 accumulate).
    qkv = jnp.dot(x.astype(jnp.bfloat16), wqkv_ref[...],
                  preferred_element_type=jnp.float32) + bqkv_ref[...]   # (S, 3H) f32

    q = (qkv[:, :H] * scale).astype(jnp.bfloat16)           # DistilBERT scales q
    kT = qkv[:, H:2 * H].T.astype(jnp.bfloat16)             # (H, S): one transpose
    v = qkv[:, 2 * H:].astype(jnp.bfloat16)                 # (S, H)
    mask = mb_ref[0]                                        # (1, S) additive bias

    ctx_heads = []
    for h in range(n_heads):                                # static, unrolled head loop
        sl = slice(h * head_dim, (h + 1) * head_dim)
        scores = jnp.dot(q[:, sl], kT[sl, :],
                         preferred_element_type=jnp.float32)            # (S, S), NN
        scores = scores + mask
        m = jnp.max(scores, axis=-1, keepdims=True)
        p = jnp.exp(scores - m)
        denom = jnp.sum(p, axis=-1, keepdims=True)
        p = p * pl.reciprocal(denom, approx=True)           # EUP reciprocal, not VALU
        ctx_heads.append(jnp.dot(p.astype(jnp.bfloat16), v[:, sl],
                                 preferred_element_type=jnp.float32))
    ctx = jnp.concatenate(ctx_heads, axis=-1)               # (S, H): lane-dense

    sa = jnp.dot(ctx.astype(jnp.bfloat16), wo_ref[...],
                 preferred_element_type=jnp.float32) + bo_ref[...]
    o_ref[0] = _ln(sa + x, g_ref[...], b_ref[...]).astype(o_ref.dtype)


def attention_block(x, mask_bias, w_qkv, b_qkv, wo, bo, gamma, beta, *, n_heads):
    """Fused QKV + all-heads attention + output projection + residual + LayerNorm."""
    B, S, H = x.shape
    threeH = w_qkv.shape[1]
    Dh = H // n_heads
    scale = 1.0 / math.sqrt(Dh)
    return pl.pallas_call(
        partial(_attn_kernel, n_heads=n_heads, head_dim=Dh, scale=scale),
        out_shape=jax.ShapeDtypeStruct((B, S, H), jnp.float32),
        grid=(B,),
        in_specs=[pl.BlockSpec((1, S, H), lambda b: (b, 0, 0)),
                  pl.BlockSpec((1, 1, S), lambda b: (b, 0, 0)),
                  pl.BlockSpec((H, threeH), lambda b: (0, 0)),
                  pl.BlockSpec((1, threeH), lambda b: (0, 0)),
                  pl.BlockSpec((H, H), lambda b: (0, 0)),
                  pl.BlockSpec((1, H), lambda b: (0, 0)),
                  pl.BlockSpec((1, H), lambda b: (0, 0)),
                  pl.BlockSpec((1, H), lambda b: (0, 0))],
        out_specs=pl.BlockSpec((1, S, H), lambda b: (b, 0, 0)),
        compiler_params=pltpu.CompilerParams(
            dimension_semantics=("parallel",),
            vmem_limit_bytes=VMEM_LIMIT),
    )(x, mask_bias, w_qkv, b_qkv.reshape(1, threeH), wo, bo.reshape(1, H),
      gamma.reshape(1, H), beta.reshape(1, H))


def _ffn_kernel(x_ref, w1_ref, b1_ref, w2_ref, b2_ref, g_ref, b_ref, o_ref):
    x = x_ref[...]                                          # (tm, H) f32
    h = jnp.dot(x.astype(jnp.bfloat16), w1_ref[...],
                preferred_element_type=jnp.float32) + b1_ref[...]
    h = _gelu(h)
    y = jnp.dot(h.astype(jnp.bfloat16), w2_ref[...],
                preferred_element_type=jnp.float32) + b2_ref[...]
    o_ref[...] = _ln(y + x, g_ref[...], b_ref[...]).astype(o_ref.dtype)


def ffn_block(x, w1, b1, w2, b2, gamma, beta):
    """Fused FFN: w1 + GELU + w2 + residual + LayerNorm, tiled over tokens."""
    M, H = x.shape
    Dff = w1.shape[1]
    tm = _token_tile(M)
    return pl.pallas_call(
        _ffn_kernel,
        out_shape=jax.ShapeDtypeStruct((M, H), jnp.float32),
        grid=(M // tm,),
        in_specs=[pl.BlockSpec((tm, H), lambda i: (i, 0)),
                  pl.BlockSpec((H, Dff), lambda i: (0, 0)),
                  pl.BlockSpec((1, Dff), lambda i: (0, 0)),
                  pl.BlockSpec((Dff, H), lambda i: (0, 0)),
                  pl.BlockSpec((1, H), lambda i: (0, 0)),
                  pl.BlockSpec((1, H), lambda i: (0, 0)),
                  pl.BlockSpec((1, H), lambda i: (0, 0))],
        out_specs=pl.BlockSpec((tm, H), lambda i: (i, 0)),
        compiler_params=pltpu.CompilerParams(
            dimension_semantics=("parallel",),
            vmem_limit_bytes=VMEM_LIMIT),
    )(x, w1, b1.reshape(1, Dff), w2, b2.reshape(1, H), gamma.reshape(1, H),
      beta.reshape(1, H))


# ----------------------------- model (glue in JAX) ---------------------------

class Config:
    vocab_size = 50      # small synthetic vocab (real distilbert: 30522)
    max_pos = 16         # real: 512
    dim = 64             # real: 768
    n_heads = 4          # real: 12
    n_layers = 2         # real: 6
    hidden_dim = 128     # real: 3072


def init_params(cfg):
    key = jax.random.PRNGKey(0)

    def nxt(shape, scale=0.02):
        nonlocal key
        key, sub = jax.random.split(key)
        return (scale * jax.random.normal(sub, shape)).astype(jnp.float32)

    params = {
        "word_emb": nxt((cfg.vocab_size, cfg.dim)),
        "pos_emb": nxt((cfg.max_pos, cfg.dim)),
        "emb_ln_g": jnp.ones((cfg.dim,), jnp.float32),
        "emb_ln_b": jnp.zeros((cfg.dim,), jnp.float32),
        "layers": [],
    }
    for _ in range(cfg.n_layers):
        wq, wk, wv = nxt((cfg.dim, cfg.dim)), nxt((cfg.dim, cfg.dim)), nxt((cfg.dim, cfg.dim))
        layer = {
            # matmul weights stored in bf16 (MXU-friendly, halves HBM/VMEM traffic)
            "w_qkv": jnp.concatenate([wq, wk, wv], axis=1).astype(jnp.bfloat16),
            "b_qkv": jnp.zeros((3 * cfg.dim,), jnp.float32),
            "wo": nxt((cfg.dim, cfg.dim)).astype(jnp.bfloat16),
            "bo": jnp.zeros((cfg.dim,), jnp.float32),
            "ln1_g": jnp.ones((cfg.dim,), jnp.float32),
            "ln1_b": jnp.zeros((cfg.dim,), jnp.float32),
            "w1": nxt((cfg.dim, cfg.hidden_dim)).astype(jnp.bfloat16),
            "b1": jnp.zeros((cfg.hidden_dim,), jnp.float32),
            "w2": nxt((cfg.hidden_dim, cfg.dim)).astype(jnp.bfloat16),
            "b2": jnp.zeros((cfg.dim,), jnp.float32),
            "ln2_g": jnp.ones((cfg.dim,), jnp.float32),
            "ln2_b": jnp.zeros((cfg.dim,), jnp.float32),
        }
        params["layers"].append(layer)
    return params


def pretrained_bert_encoder_forward(params, input_ids, attention_mask, cfg):
    """Returns last_hidden_state of shape (B, S, H), like the PyTorch module."""
    B, S = input_ids.shape
    H = cfg.dim
    M = B * S

    # --- embeddings (gather is plain-JAX glue; LayerNorm is a Pallas kernel) ---
    word = params["word_emb"][input_ids]                    # (B, S, H)
    pos = params["pos_emb"][jnp.arange(S)]                  # (S, H)
    emb = (word + pos[None, :, :]).reshape(M, H)
    x = layernorm(emb, params["emb_ln_g"], params["emb_ln_b"])

    # DistilBERT masks scores where attention_mask == 0 (additive large-negative bias)
    mask_bias = ((1.0 - attention_mask.astype(jnp.float32)) * -1e9).reshape(B, 1, S)

    for layer in params["layers"]:
        x = attention_block(x.reshape(B, S, H), mask_bias,
                            layer["w_qkv"], layer["b_qkv"],
                            layer["wo"], layer["bo"],
                            layer["ln1_g"], layer["ln1_b"],
                            n_heads=cfg.n_heads).reshape(M, H)
        x = ffn_block(x, layer["w1"], layer["b1"], layer["w2"], layer["b2"],
                      layer["ln2_g"], layer["ln2_b"])

    return x.reshape(B, S, H)   # last_hidden_state


if __name__ == "__main__":
    cfg = Config()
    params = init_params(cfg)

    B, S = 2, 8
    input_ids = jax.random.randint(jax.random.PRNGKey(0), (B, S), 0, cfg.vocab_size,
                                   dtype=jnp.int32)
    attention_mask = jnp.array([[1, 1, 1, 1, 1, 1, 1, 1],
                                [1, 1, 1, 1, 1, 1, 0, 0]], dtype=jnp.int32)

    out = pretrained_bert_encoder_forward(params, input_ids, attention_mask, cfg)
    out = jax.block_until_ready(out)

    assert out.shape == (B, S, cfg.dim), out.shape
    assert bool(jnp.all(jnp.isfinite(out)))
    print("KERNEL_OK")
</pallas_src>

<mosaic_0001>
module attributes {stable_mosaic.version = 11 : i64} {
  func.func @_layernorm_kernel(%arg0: i32, %arg1: memref<16x64xf32, #tpu.memory_space<vmem>>, %arg2: memref<1x64xf32, #tpu.memory_space<vmem>>, %arg3: memref<1x64xf32, #tpu.memory_space<vmem>>, %arg4: memref<16x64xf32, #tpu.memory_space<vmem>>) attributes {dimension_semantics = [#tpu.dimension_semantics<parallel>], iteration_bounds = array<i64: 1>, scalar_prefetch = 0 : i64, scratch_operands = 0 : i64, tpu.core_type = #tpu.core_type<tc>, window_params = [{transform_indices = @transform_0, window_bounds = array<i64: 16, 64>}, {pipeline_mode = #tpu.pipeline_mode<synchronous>, transform_indices = @transform_1, window_bounds = array<i64: 1, 64>}, {pipeline_mode = #tpu.pipeline_mode<synchronous>, transform_indices = @transform_2, window_bounds = array<i64: 1, 64>}, {transform_indices = @transform_3, window_bounds = array<i64: 16, 64>}]} {
    %c0 = arith.constant 0 : index
    %c0_0 = arith.constant 0 : index
    %0 = vector.load %arg1[%c0, %c0_0] : memref<16x64xf32, #tpu.memory_space<vmem>>, vector<16x64xf32>
    %c0_1 = arith.constant 0 : index
    %c0_2 = arith.constant 0 : index
    %1 = vector.load %arg2[%c0_1, %c0_2] : memref<1x64xf32, #tpu.memory_space<vmem>>, vector<1x64xf32>
    %c0_3 = arith.constant 0 : index
    %c0_4 = arith.constant 0 : index
    %2 = vector.load %arg3[%c0_3, %c0_4] : memref<1x64xf32, #tpu.memory_space<vmem>>, vector<1x64xf32>
    %cst = arith.constant dense<0.000000e+00> : vector<16xf32>
    %3 = vector.multi_reduction <add>, %0, %cst [1] : vector<16x64xf32> to vector<16xf32>
    %4 = vector.shape_cast %3 : vector<16xf32> to vector<16x1xf32>
    %cst_5 = arith.constant 6.400000e+01 : f32
    %5 = vector.broadcast %cst_5 : f32 to vector<16x1xf32>
    %6 = arith.divf %4, %5 : vector<16x1xf32>
    %7 = vector.broadcast %6 : vector<16x1xf32> to vector<16x64xf32>
    %8 = arith.subf %0, %7 : vector<16x64xf32>
    %9 = arith.mulf %8, %8 : vector<16x64xf32>
    %cst_6 = arith.constant dense<0.000000e+00> : vector<16xf32>
    %10 = vector.multi_reduction <add>, %9, %cst_6 [1] : vector<16x64xf32> to vector<16xf32>
    %11 = vector.shape_cast %10 : vector<16xf32> to vector<16x1xf32>
    %cst_7 = arith.constant 6.400000e+01 : f32
    %12 = vector.broadcast %cst_7 : f32 to vector<16x1xf32>
    %13 = arith.divf %11, %12 : vector<16x1xf32>
    %14 = vector.broadcast %6 : vector<16x1xf32> to vector<16x64xf32>
    %15 = arith.subf %0, %14 : vector<16x64xf32>
    %cst_8 = arith.constant 9.99999996E-13 : f32
    %16 = vector.broadcast %cst_8 : f32 to vector<16x1xf32>
    %17 = arith.addf %13, %16 : vector<16x1xf32>
    %18 = math.rsqrt %17 : vector<16x1xf32>
    %19 = vector.broadcast %18 : vector<16x1xf32> to vector<16x64xf32>
    %20 = arith.mulf %15, %19 : vector<16x64xf32>
    %21 = vector.broadcast %1 : vector<1x64xf32> to vector<16x64xf32>
    %22 = arith.mulf %20, %21 : vector<16x64xf32>
    %23 = vector.broadcast %2 : vector<1x64xf32> to vector<16x64xf32>
    %24 = arith.addf %22, %23 : vector<16x64xf32>
    %c0_9 = arith.constant 0 : index
    %c0_10 = arith.constant 0 : index
    %25 = vector.load %arg4[%c0_9, %c0_10] : memref<16x64xf32, #tpu.memory_space<vmem>>, vector<16x64xf32>
    tpu.vector_store %arg4[%c0_9, %c0_10], %24 {strides = array<i32>} : memref<16x64xf32, #tpu.memory_space<vmem>>, vector<16x64xf32>,
    return
  }
  func.func @transform_0(%arg0: i32) -> (i32, i32) {
    %c0_i32 = arith.constant 0 : i32
    %c0_i32_0 = arith.constant 0 : i32
    return %arg0, %c0_i32 : i32, i32
  }
  func.func @transform_1(%arg0: i32) -> (i32, i32) {
    %c0_i32 = arith.constant 0 : i32
    %c0_i32_0 = arith.constant 0 : i32
    %c0_i32_1 = arith.constant 0 : i32
    return %c0_i32, %c0_i32_0 : i32, i32
  }
  func.func @transform_2(%arg0: i32) -> (i32, i32) {
    %c0_i32 = arith.constant 0 : i32
    %c0_i32_0 = arith.constant 0 : i32
    %c0_i32_1 = arith.constant 0 : i32
    return %c0_i32, %c0_i32_0 : i32, i32
  }
  func.func @transform_3(%arg0: i32) -> (i32, i32) {
    %c0_i32 = arith.constant 0 : i32
    %c0_i32_0 = arith.constant 0 : i32
    return %arg0, %c0_i32 : i32, i32
  }
}

</mosaic_0001>

<bundles_post_ra>
// kernel: tpu_custom_call.1
= control target key start
LH: loop header
LB: loop body
LE: loop exit
PB: predicated region body
PF: predicated region fallthrough
CT: control target
= control target key end

     0   :  { %8 = vsyncpa [#allocation3], 0  ;;  %s198_s0 = inlined_call_operand.hbm [shape: f32[16,64], index: 0, kind: input, shape index: {}]   ;;  %s199_s1 = inlined_call_operand.vmem [shape: f32[1,64], index: 1, kind: input, shape index: {}]   ;;  %s200_s2 = inlined_call_operand.vmem [shape: f32[1,64], index: 2, kind: input, shape index: {}]   ;;  %s201_s3 = inlined_call_operand.hbm [shape: f32[16,64], index: 3, kind: output, shape index: {}]  }
   0x1   :  { %9 = vsyncpa [#allocation4], 0  ;;  %s150_s12 = smov [#allocation2]  }
   0x2   :  { %s15_s13 = sshll.u32 %s150_s12, 4  ;;  %s16_s13 = int_to_ptr.vmem [resolvable:$true] %s15_s13 }
   0x3   :  { %s114_s14 = scalar_lea.vmem %s16_s13, 256  ;;  %p119_p1 = scmp.lt.s32.totalorder %s16_s13, %s16_s13 }
   0x4   :  { %p115_p0 = scmp.ne.s32.totalorder %s16_s13, %s114_s14  ;;  %p120_p2 = scmp.lt.s32.totalorder %s114_s14, %s114_s14 }
   0x6   :  { %p121_p3 = por %p120_p2, %p119_p1 }
   0x8   :  { %p122_p4 = pnand %p121_p3, %p115_p0 }
   0xa   :  { %125 = shalt.err (!%p122_p4)
}
   0xb   :  { %s151_s15 = smov 128   ;;  %s152_s16 = smov 8  }
   0xc   :  { %21 = dma.hbm_to_vmem [thread:$0]  %s198_s0, 256, %s16_s13, [#allocation3], %s151_s15, %s151_s15, %s152_s16  }
   0xd   :  { %146 = dma.done.wait [#allocation3], 256  }
   0xe   :  { %147 = vsyncadd [#allocation3], 4294967040  ;;  %vm33_vm0 = vcmask 523264   ;;  %v29_v0 = vld [vmem:[#allocation2] sm:$0xff]  ;;  %v30_v1 = vld [vmem:[#allocation2 + $0x8] sm:$0xff]  ;;  %s153_s22 = smov [#allocation5]  }
   0xf   :  { %v34_v2 = vsel %vm33_vm0, %v29_v0, 0.0  ;;  %v37_v3 = vsel %vm33_vm0, %v30_v1, 0.0  ;;  %v96_v21 = vld [vmem:[%s199_s1] ss:$0 sm:$0xff]  ;;  %s84_s23 = sshll.u32 %s153_s22, 4  ;;  %s85_s23 = int_to_ptr.vmem [resolvable:$true] %s84_s23 }
  0x10   :  { %35 = vadd.xlane.f32.xlu0 %v34_v2  ;;  %v97_v23 = vld [vmem:[%s200_s2] ss:$0 sm:$0xff]  ;;  %s126_s24 = scalar_lea.vmem %s85_s23, 256  ;;  %p131_p6 = scmp.lt.s32.totalorder %s85_s23, %s85_s23 }
  0x11   :  { %p127_p5 = scmp.ne.s32.totalorder %s85_s23, %s126_s24  ;;  %p132_p7 = scmp.lt.s32.totalorder %s126_s24, %s126_s24 }
  0x13   :  { %p133_p8 = por %p132_p7, %p131_p6 }
  0x14   :  { %38 = vadd.xlane.f32.xlu0 %v37_v3 }
  0x15   :  { %p134_p9 = pnand %p133_p8, %p127_p5 }
  0x99   :  { %v36_v4 = vpop.xlane.xlu0 %35 }
  0x9a   :  { %v41_v5 = vmul.f32 0.015625, %v36_v4 }
  0x9c   :  { %v43_v6 = vsub.f32 %v29_v0, %v41_v5 }
  0x9d   :  { %v39_v7 = vpop.xlane.xlu0 %38 }
  0x9e   :  { %v42_v8 = vmul.f32 0.015625, %v39_v7  ;;  %v45_v9 = vmul.f32 %v43_v6, %v43_v6 }
  0xa0   :  { %v44_v10 = vsub.f32 %v30_v1, %v42_v8  ;;  %v47_v11 = vsel %vm33_vm0, %v45_v9, 0.0 }
  0xa1   :  { %48 = vadd.xlane.f32.xlu1 %v47_v11 }
  0xa2   :  { %v46_v12 = vmul.f32 %v44_v10, %v44_v10 }
  0xa4   :  { %v50_v13 = vsel %vm33_vm0, %v46_v12, 0.0 }
  0xa5   :  { %51 = vadd.xlane.f32.xlu1 %v50_v13 }
 0x12a   :  { %v49_v14 = vpop.xlane.xlu1 %48 }
 0x12b   :  { %v53_v15 = vmul.f32 0.015625, %v49_v14 }
 0x12d   :  { %v55_v16 = vadd.f32 1e-12, %v53_v15 }
 0x12e   :  { %v52_v17 = vpop.xlane.xlu1 %51 }
 0x12f   :  { %102 = vrsqrt.f32 %v55_v16  ;;  %v54_v18 = vmul.f32 0.015625, %v52_v17 }
 0x131   :  { %v56_v19 = vadd.f32 1e-12, %v54_v18 }
 0x133   :  { %104 = vrsqrt.f32 %v56_v19 }
 0x13c   :  { %v103_v20 = vpop.eup %102 }
 0x13d   :  { %v59_v22 = vmul.f32 %v103_v20, %v43_v6 }
 0x13f   :  { %v67_v24 = vmul.f32 %v96_v21, %v59_v22 }
 0x140   :  { %v105_v25 = vpop.eup %104 }
 0x141   :  { %v60_v26 = vmul.f32 %v105_v25, %v44_v10  ;;  %v75_v27 = vadd.f32 %v97_v23, %v67_v24 }
 0x143   :  { %v68_v28 = vmul.f32 %v96_v21, %v60_v26  ;;  %77 = vst.msk [vmem:[#allocation5] sm:$0xff] %vm33_vm0, %v75_v27 }
 0x145   :  { %v76_v29 = vadd.f32 %v97_v23, %v68_v28 }
 0x147   :  { %78 = vst.msk [vmem:[#allocation5 + $0x8] sm:$0xff] %vm33_vm0, %v76_v29 }
 0x148   :  { %137 = shalt.err (!%p134_p9)
}
 0x149   :  { %90 = dma.vmem_to_hbm [thread:$0]  %s85_s23, 256, %s201_s3, [#allocation4], %s151_s15, %s151_s15, %s152_s16  }
 0x14a   :  { %148 = dma.done.wait [#allocation4], 256  }
 0x14b   :  { %149 = vsyncadd [#allocation4], 4294967040 }
 0x14c   :  { %94 = vsyncpa [#allocation3], 1 }
 0x14d   :  { %95 = vsyncpa [#allocation4], 1 }

</bundles_post_ra>
